<compile_context>
chip_gen: v7x
topology: tpu7x:2x2x1
jax: 0.10.0
libtpu: 0.0.40
codegen_flags: <defaults>
</compile_context>

<pallas_src>
import functools
import warnings

import jax
import jax.numpy as jnp
from jax.experimental import pallas as pl
from jax.experimental.pallas import tpu as pltpu

_LANE = 128           # TPU lane width; pad feature dims to multiples of this.
_MIB = 1024 * 1024


def _round_up(n, m):
    return ((n + m - 1) // m) * m


# ----------------------------------------------------------------------------
# Kernel
# ----------------------------------------------------------------------------
def _mlp_kernel(*refs, num_hidden_layers, compute_dtype):
    """Fused MLP forward on one batch tile.

    refs layout:
      x_ref,                                  # (TILE_M, in_pad)   input dtype
      (w_ref, b_ref) * num_hidden_layers,     # hidden layers (Linear + ReLU)
      w_out_ref, b_out_ref,                   # final Linear (no ReLU)
      o_ref                                   # (TILE_M, out_pad)  out dtype
    Weights are (in_pad, out_pad) in compute_dtype; biases are (1, out_pad) f32.
    """
    x_ref = refs[0]
    o_ref = refs[-1]
    param_refs = refs[1:-1]

    # Cast in-kernel: avoids a wrapper-side cast/pad HBM round-trip on x.
    h = x_ref[...].astype(compute_dtype)

    # Hidden layers: Linear (MXU, f32 accumulate) + bias + ReLU in f32.
    for layer in range(num_hidden_layers):
        w = param_refs[2 * layer][...]
        b = param_refs[2 * layer + 1][...]          # (1, hidden_pad) f32
        acc = jnp.dot(h, w, preferred_element_type=jnp.float32)
        acc = jnp.maximum(acc + b, 0.0)             # bias + ReLU in f32
        h = acc.astype(compute_dtype)               # back to compute dtype

    # Output layer: Linear (no activation).
    w = param_refs[-2][...]
    b = param_refs[-1][...]
    out = jnp.dot(h, w, preferred_element_type=jnp.float32) + b
    o_ref[...] = out.astype(o_ref.dtype)


# ----------------------------------------------------------------------------
# Param preparation (hoisted out of the forward path: transpose/pad/cast once)
# ----------------------------------------------------------------------------
def prepare_params(params, compute_dtype=jnp.bfloat16):
    """params: list of (W, b) with W shaped (out_dim, in_dim) like nn.Linear.

    Returns (flat_params, meta) where flat_params is
      (W0^T padded, b0 padded, W1^T padded, b1 padded, ...)
    with weights in `compute_dtype` shaped (in_pad, out_pad) and biases in f32
    shaped (1, out_pad). Zero padding keeps real outputs exact.
    """
    in_dim = int(params[0][0].shape[1])
    out_dim = int(params[-1][0].shape[0])

    flat = []
    prev_pad = _round_up(in_dim, _LANE)
    in_pad = prev_pad
    for W, b in params:
        W = jnp.asarray(W, jnp.float32)
        b = jnp.asarray(b, jnp.float32)
        d_out = W.shape[0]
        # round_up to 128: a 129..255-wide layer lands on 256 automatically,
        # which fully feeds the v6e/v7x 256x256 MXU; exactly-128 layers are
        # kept at 128 (don't double weight bytes for tiny layers).
        d_out_pad = _round_up(d_out, _LANE)
        Wt = W.T  # (in, out)
        Wt = jnp.pad(Wt, ((0, prev_pad - Wt.shape[0]), (0, d_out_pad - d_out)))
        bp = jnp.pad(b, (0, d_out_pad - d_out)).reshape(1, d_out_pad)
        flat.append(Wt.astype(compute_dtype))
        flat.append(bp)  # bias kept in f32
        prev_pad = d_out_pad

    meta = dict(in_dim=in_dim, in_dim_padded=in_pad,
                out_dim=out_dim, out_dim_padded=prev_pad)
    return tuple(flat), meta


# ----------------------------------------------------------------------------
# Forward wrapper
# ----------------------------------------------------------------------------
def configurable_nn_forward(x, flat_params, meta, compute_dtype=jnp.bfloat16,
                            tile_m=None, out_dtype=None):
    batch, in_dim = x.shape
    assert in_dim == meta["in_dim"]
    in_pad = meta["in_dim_padded"]
    out_dim = meta["out_dim"]
    out_pad = meta["out_dim_padded"]
    num_hidden_layers = len(flat_params) // 2 - 1

    if out_dtype is None:
        out_dtype = x.dtype   # pass bf16 here to halve output write-back bytes

    # Sublane granularity of the narrowest VMEM-tiled array (x tile / out tile).
    min_itemsize = min(jnp.dtype(x.dtype).itemsize, jnp.dtype(out_dtype).itemsize)
    sub = 8 if min_itemsize >= 4 else (16 if min_itemsize == 2 else 32)

    # Batch tile: 512 for big batches (~85% of HBM roofline vs ~63% at 256);
    # for mid batches pick a tile that yields >=2 grid steps so both v7x
    # TensorCores get work; tiny demo batches become a single tile.
    if tile_m is None:
        if batch >= 1024:
            tile_m = 512
        elif batch >= 2 * sub:
            tile_m = _round_up(pl.cdiv(batch, 2), sub)
        else:
            tile_m = _round_up(max(batch, sub), sub)
    batch_pad = _round_up(batch, tile_m)

    # Only pad when actually needed; cast to compute dtype happens in-kernel.
    if (in_pad != in_dim) or (batch_pad != batch):
        xp = jnp.pad(x, ((0, batch_pad - batch), (0, in_pad - in_dim)))
    else:
        xp = x

    # --- VMEM budgeting ------------------------------------------------------
    param_bytes = sum(int(p.size) * p.dtype.itemsize for p in flat_params)  # Buffered(1)
    x_tile_bytes = 2 * tile_m * in_pad * jnp.dtype(xp.dtype).itemsize       # double-buffered
    o_tile_bytes = 2 * tile_m * out_pad * jnp.dtype(out_dtype).itemsize     # double-buffered
    max_feat_pad = max([in_pad, out_pad] + [int(p.shape[-1]) for p in flat_params])
    act_bytes = 3 * tile_m * max_feat_pad * 4                               # f32 temps headroom
    vmem_limit = int(1.2 * (param_bytes + x_tile_bytes + o_tile_bytes + act_bytes)) + 4 * _MIB
    vmem_limit = min(vmem_limit, 100 * _MIB)

    if param_bytes > 40 * _MIB:
        # TODO(synk): stream weights per layer (stacked (L,H,H) + layer grid
        # axis) instead of holding them resident; required for very wide nets
        # on v7x (64 MiB VMEM/TC).
        warnings.warn(
            f"Resident params are {param_bytes / _MIB:.1f} MiB; may exceed "
            "v7x VMEM (64 MiB/TC). Consider streaming weights per layer.")

    # --- Specs ----------------------------------------------------------------
    in_specs = [pl.BlockSpec((tile_m, in_pad), lambda i: (i, 0))]
    for p in flat_params:
        # Full-array block, constant index_map -> resident across batch tiles.
        # Buffered(1): no pointless double-buffer for block-invariant params.
        in_specs.append(pl.BlockSpec(p.shape, lambda i: (0, 0),
                                     pipeline_mode=pl.Buffered(1)))
    out_specs = pl.BlockSpec((tile_m, out_pad), lambda i: (i, 0))

    kernel = functools.partial(_mlp_kernel,
                               num_hidden_layers=num_hidden_layers,
                               compute_dtype=compute_dtype)

    out_padded = pl.pallas_call(
        kernel,
        out_shape=jax.ShapeDtypeStruct((batch_pad, out_pad), out_dtype),
        grid=(batch_pad // tile_m,),
        in_specs=in_specs,
        out_specs=out_specs,
        compiler_params=pltpu.CompilerParams(
            dimension_semantics=("parallel",),
            vmem_limit_bytes=vmem_limit),
    )(xp, *flat_params)

    return out_padded[:batch, :out_dim]


def make_forward(params, compute_dtype=jnp.bfloat16, tile_m=None, out_dtype=None):
    """Build a jitted forward fn with params prepared (transposed/padded) once."""
    flat_params, meta = prepare_params(params, compute_dtype)

    @jax.jit
    def forward(x):
        return configurable_nn_forward(x, flat_params, meta,
                                       compute_dtype=compute_dtype,
                                       tile_m=tile_m, out_dtype=out_dtype)

    return forward


# ----------------------------------------------------------------------------
# Reference + init (mimics nn.Linear)
# ----------------------------------------------------------------------------
def _init_params(key, input_dim, hidden_size, output_dim, num_layers):
    """Deterministic init mimicking nn.Linear's U(-1/sqrt(in), 1/sqrt(in))."""
    params = []
    in_dim = input_dim
    for _ in range(num_layers):
        key, kw, kb = jax.random.split(key, 3)
        bound = 1.0 / jnp.sqrt(in_dim)
        W = jax.random.uniform(kw, (hidden_size, in_dim), jnp.float32, -bound, bound)
        b = jax.random.uniform(kb, (hidden_size,), jnp.float32, -bound, bound)
        params.append((W, b))
        in_dim = hidden_size
    key, kw, kb = jax.random.split(key, 3)
    bound = 1.0 / jnp.sqrt(in_dim)
    W = jax.random.uniform(kw, (output_dim, in_dim), jnp.float32, -bound, bound)
    b = jax.random.uniform(kb, (output_dim,), jnp.float32, -bound, bound)
    params.append((W, b))
    return params


def _reference_forward(x, params):
    h = x
    for (W, b) in params[:-1]:
        h = jnp.maximum(h @ W.T + b, 0.0)
    W, b = params[-1]
    return h @ W.T + b


if __name__ == "__main__":
    # Small shapes consistent with the module's forward: 2-D (batch, input_dim).
    batch, input_dim, hidden_size, output_dim, num_layers = 8, 16, 32, 4, 2

    key = jax.random.PRNGKey(0)
    key, kx = jax.random.split(key)
    x = jax.random.normal(kx, (batch, input_dim), jnp.float32)

    params = _init_params(key, input_dim, hidden_size, output_dim, num_layers)
    ref = _reference_forward(x, params)

    # f32 path: exact (modulo MXU f32 handling) vs. reference.
    fwd_f32 = make_forward(params, compute_dtype=jnp.float32)
    out_f32 = jax.block_until_ready(fwd_f32(x))
    assert out_f32.shape == (batch, output_dim)
    assert jnp.allclose(out_f32, ref, atol=1e-4, rtol=1e-4), "f32 mismatch vs reference"

    # bf16 matmul path (default, MXU-friendly): looser tolerance.
    fwd_bf16 = make_forward(params, compute_dtype=jnp.bfloat16)
    out_bf16 = jax.block_until_ready(fwd_bf16(x))
    assert out_bf16.shape == (batch, output_dim)
    assert jnp.allclose(out_bf16, ref, atol=5e-2, rtol=5e-2), "bf16 mismatch vs reference"

    print("KERNEL_OK")
</pallas_src>

<mosaic_0001>
module attributes {stable_mosaic.version = 11 : i64} {
  func.func @_mlp_kernel(%arg0: i32, %arg1: memref<8x128xf32, #tpu.memory_space<vmem>>, %arg2: memref<128x128xf32, #tpu.memory_space<vmem>>, %arg3: memref<1x128xf32, #tpu.memory_space<vmem>>, %arg4: memref<128x128xf32, #tpu.memory_space<vmem>>, %arg5: memref<1x128xf32, #tpu.memory_space<vmem>>, %arg6: memref<128x128xf32, #tpu.memory_space<vmem>>, %arg7: memref<1x128xf32, #tpu.memory_space<vmem>>, %arg8: memref<8x128xf32, #tpu.memory_space<vmem>>) attributes {dimension_semantics = [#tpu.dimension_semantics<parallel>], iteration_bounds = array<i64: 1>, scalar_prefetch = 0 : i64, scratch_operands = 0 : i64, tpu.core_type = #tpu.core_type<tc>, window_params = [{transform_indices = @transform_0, window_bounds = array<i64: 8, 128>}, {pipeline_mode = #tpu.pipeline_mode<synchronous>, transform_indices = @transform_1, window_bounds = array<i64: 128, 128>}, {pipeline_mode = #tpu.pipeline_mode<synchronous>, transform_indices = @transform_2, window_bounds = array<i64: 1, 128>}, {pipeline_mode = #tpu.pipeline_mode<synchronous>, transform_indices = @transform_3, window_bounds = array<i64: 128, 128>}, {pipeline_mode = #tpu.pipeline_mode<synchronous>, transform_indices = @transform_4, window_bounds = array<i64: 1, 128>}, {pipeline_mode = #tpu.pipeline_mode<synchronous>, transform_indices = @transform_5, window_bounds = array<i64: 128, 128>}, {pipeline_mode = #tpu.pipeline_mode<synchronous>, transform_indices = @transform_6, window_bounds = array<i64: 1, 128>}, {transform_indices = @transform_7, window_bounds = array<i64: 8, 128>}]} {
    %c0 = arith.constant 0 : index
    %c0_0 = arith.constant 0 : index
    %0 = vector.load %arg1[%c0, %c0_0] : memref<8x128xf32, #tpu.memory_space<vmem>>, vector<8x128xf32>
    %c0_1 = arith.constant 0 : index
    %c0_2 = arith.constant 0 : index
    %1 = vector.load %arg2[%c0_1, %c0_2] : memref<128x128xf32, #tpu.memory_space<vmem>>, vector<128x128xf32>
    %c0_3 = arith.constant 0 : index
    %c0_4 = arith.constant 0 : index
    %2 = vector.load %arg3[%c0_3, %c0_4] : memref<1x128xf32, #tpu.memory_space<vmem>>, vector<1x128xf32>
    %cst = arith.constant dense<0.000000e+00> : vector<8x128xf32>
    %3 = tpu.matmul %0, %1, %cst {dimension_numbers = #tpu.dot_dimension_numbers<[1], [0], [0], [1], [0, 0, 1, 1], [], []>} : vector<8x128xf32>, vector<128x128xf32>, vector<8x128xf32> -> vector<8x128xf32>
    %4 = vector.broadcast %2 : vector<1x128xf32> to vector<8x128xf32>
    %5 = arith.addf %3, %4 : vector<8x128xf32>
    %cst_5 = arith.constant 0.000000e+00 : f32
    %6 = vector.broadcast %cst_5 : f32 to vector<8x128xf32>
    %7 = arith.maximumf %5, %6 : vector<8x128xf32>
    %c0_6 = arith.constant 0 : index
    %c0_7 = arith.constant 0 : index
    %8 = vector.load %arg4[%c0_6, %c0_7] : memref<128x128xf32, #tpu.memory_space<vmem>>, vector<128x128xf32>
    %c0_8 = arith.constant 0 : index
    %c0_9 = arith.constant 0 : index
    %9 = vector.load %arg5[%c0_8, %c0_9] : memref<1x128xf32, #tpu.memory_space<vmem>>, vector<1x128xf32>
    %cst_10 = arith.constant dense<0.000000e+00> : vector<8x128xf32>
    %10 = tpu.matmul %7, %8, %cst_10 {dimension_numbers = #tpu.dot_dimension_numbers<[1], [0], [0], [1], [0, 0, 1, 1], [], []>} : vector<8x128xf32>, vector<128x128xf32>, vector<8x128xf32> -> vector<8x128xf32>
    %11 = vector.broadcast %9 : vector<1x128xf32> to vector<8x128xf32>
    %12 = arith.addf %10, %11 : vector<8x128xf32>
    %cst_11 = arith.constant 0.000000e+00 : f32
    %13 = vector.broadcast %cst_11 : f32 to vector<8x128xf32>
    %14 = arith.maximumf %12, %13 : vector<8x128xf32>
    %c0_12 = arith.constant 0 : index
    %c0_13 = arith.constant 0 : index
    %15 = vector.load %arg6[%c0_12, %c0_13] : memref<128x128xf32, #tpu.memory_space<vmem>>, vector<128x128xf32>
    %c0_14 = arith.constant 0 : index
    %c0_15 = arith.constant 0 : index
    %16 = vector.load %arg7[%c0_14, %c0_15] : memref<1x128xf32, #tpu.memory_space<vmem>>, vector<1x128xf32>
    %cst_16 = arith.constant dense<0.000000e+00> : vector<8x128xf32>
    %17 = tpu.matmul %14, %15, %cst_16 {dimension_numbers = #tpu.dot_dimension_numbers<[1], [0], [0], [1], [0, 0, 1, 1], [], []>} : vector<8x128xf32>, vector<128x128xf32>, vector<8x128xf32> -> vector<8x128xf32>
    %18 = vector.broadcast %16 : vector<1x128xf32> to vector<8x128xf32>
    %19 = arith.addf %17, %18 : vector<8x128xf32>
    %c0_17 = arith.constant 0 : index
    %c0_18 = arith.constant 0 : index
    %20 = vector.load %arg8[%c0_17, %c0_18] : memref<8x128xf32, #tpu.memory_space<vmem>>, vector<8x128xf32>
    tpu.vector_store %arg8[%c0_17, %c0_18], %19 {strides = array<i32>} : memref<8x128xf32, #tpu.memory_space<vmem>>, vector<8x128xf32>,
    return
  }
  func.func @transform_0(%arg0: i32) -> (i32, i32) {
    %c0_i32 = arith.constant 0 : i32
    %c0_i32_0 = arith.constant 0 : i32
    return %arg0, %c0_i32 : i32, i32
  }
  func.func @transform_1(%arg0: i32) -> (i32, i32) {
    %c0_i32 = arith.constant 0 : i32
    %c0_i32_0 = arith.constant 0 : i32
    %c0_i32_1 = arith.constant 0 : i32
    return %c0_i32, %c0_i32_0 : i32, i32
  }
  func.func @transform_2(%arg0: i32) -> (i32, i32) {
    %c0_i32 = arith.constant 0 : i32
    %c0_i32_0 = arith.constant 0 : i32
    %c0_i32_1 = arith.constant 0 : i32
    return %c0_i32, %c0_i32_0 : i32, i32
  }
  func.func @transform_3(%arg0: i32) -> (i32, i32) {
    %c0_i32 = arith.constant 0 : i32
    %c0_i32_0 = arith.constant 0 : i32
    %c0_i32_1 = arith.constant 0 : i32
    return %c0_i32, %c0_i32_0 : i32, i32
  }
  func.func @transform_4(%arg0: i32) -> (i32, i32) {
    %c0_i32 = arith.constant 0 : i32
    %c0_i32_0 = arith.constant 0 : i32
    %c0_i32_1 = arith.constant 0 : i32
    return %c0_i32, %c0_i32_0 : i32, i32
  }
  func.func @transform_5(%arg0: i32) -> (i32, i32) {
    %c0_i32 = arith.constant 0 : i32
    %c0_i32_0 = arith.constant 0 : i32
    %c0_i32_1 = arith.constant 0 : i32
    return %c0_i32, %c0_i32_0 : i32, i32
  }
  func.func @transform_6(%arg0: i32) -> (i32, i32) {
    %c0_i32 = arith.constant 0 : i32
    %c0_i32_0 = arith.constant 0 : i32
    %c0_i32_1 = arith.constant 0 : i32
    return %c0_i32, %c0_i32_0 : i32, i32
  }
  func.func @transform_7(%arg0: i32) -> (i32, i32) {
    %c0_i32 = arith.constant 0 : i32
    %c0_i32_0 = arith.constant 0 : i32
    return %arg0, %c0_i32 : i32, i32
  }
}

</mosaic_0001>

<bundles_post_ra>
// kernel: forward.1
= control target key start
LH: loop header
LB: loop body
LE: loop exit
PB: predicated region body
PF: predicated region fallthrough
CT: control target
= control target key end

     0   :  { %12 = vsyncpa [#allocation3], 0  ;;  %s810_s0 = inlined_call_operand.vmem [shape: f32[8,128], index: 0, kind: input, shape index: {}]   ;;  %s811_s1 = inlined_call_operand.hbm [shape: f32[128,128], index: 1, kind: input, shape index: {}]   ;;  %s812_s2 = inlined_call_operand.vmem [shape: f32[1,128], index: 2, kind: input, shape index: {}]   ;;  %s813_s3 = inlined_call_operand.hbm [shape: f32[128,128], index: 3, kind: input, shape index: {}]   ;;  %s814_s4 = inlined_call_operand.vmem [shape: f32[1,128], index: 4, kind: input, shape index: {}]   ;;  %s815_s5 = inlined_call_operand.hbm [shape: f32[128,128], index: 5, kind: input, shape index: {}]   ;;  %s816_s6 = inlined_call_operand.vmem [shape: f32[1,128], index: 6, kind: input, shape index: {}]   ;;  %s817_s7 = inlined_call_operand.vmem [shape: f32[8,128], index: 7, kind: output, shape index: {}]  }
   0x1   :  { %13 = vsyncpa [#allocation5], 0  ;;  %s665_s24 = smov [#allocation4]   ;;  %s666_s26 = smov [#allocation2]  }
   0x2   :  { %s35_s25 = sshll.u32 %s665_s24, 4  ;;  %s21_s27 = sshll.u32 %s666_s26, 4  ;;  %s36_s25 = int_to_ptr.vmem [resolvable:$true] %s35_s25  ;;  %s713_s27 = int_to_ptr.vmem [resolvable:$true] %s21_s27 }
   0x3   :  { %s595_s30 = scalar_lea.hbm %s813_s3, 2048 }
   0x4   :  { %p596_p0 = scmp.ne.s32.totalorder %s813_s3, %s595_s30  ;;  %p599_p1 = scmp.lt.u32.totalorder %s595_s30, %s813_s3 }
   0x6   :  { %p601_p2 = pnand %p599_p1, %p596_p0 }
   0x8   :  { %604 = shalt.err (!%p601_p2)
}
   0x9   :  { %s605_s12 = scalar_lea.vmem %s36_s25, 2048  ;;  %p610_p4 = scmp.lt.s32.totalorder %s36_s25, %s36_s25 }
   0xa   :  { %p606_p3 = scmp.ne.s32.totalorder %s36_s25, %s605_s12  ;;  %p611_p5 = scmp.lt.s32.totalorder %s605_s12, %s605_s12 }
   0xc   :  { %p612_p6 = por %p611_p5, %p610_p4 }
   0xe   :  { %p613_p7 = pnand %p612_p6, %p606_p3 }
  0x10   :  { %616 = shalt.err (!%p613_p7)
}
  0x11   :  { %s667_s13 = smov 128   ;;  %s668_s14 = smov 8  }
  0x12   :  { %41 = dma.hbm_to_vmem [thread:$0]  %s813_s3, 2048, %s36_s25, [#allocation5], %s667_s13, %s667_s13, %s668_s14  }
  0x13   :  { %s617_s19 = scalar_lea.hbm %s811_s1, 2048 }
  0x14   :  { %p618_p8 = scmp.ne.s32.totalorder %s811_s1, %s617_s19  ;;  %p621_p9 = scmp.lt.u32.totalorder %s617_s19, %s811_s1 }
  0x16   :  { %p623_p10 = pnand %p621_p9, %p618_p8 }
  0x18   :  { %626 = shalt.err (!%p623_p10)
}
  0x19   :  { %s627_s24 = scalar_lea.vmem %s713_s27, 2048  ;;  %p632_p12 = scmp.lt.s32.totalorder %s713_s27, %s713_s27 }
  0x1a   :  { %p628_p11 = scmp.ne.s32.totalorder %s713_s27, %s627_s24  ;;  %p633_p13 = scmp.lt.s32.totalorder %s627_s24, %s627_s24 }
  0x1c   :  { %p634_p0 = por %p633_p13, %p632_p12 }
  0x1e   :  { %p635_p1 = pnand %p634_p0, %p628_p11 }
  0x20   :  { %638 = shalt.err (!%p635_p1)
}
  0x21   :  { %27 = dma.hbm_to_vmem [thread:$0]  %s811_s1, 2048, %s713_s27, [#allocation3], %s667_s13, %s667_s13, %s668_s14  }
  0x22   :  { %s669_s26 = smov [#allocation6]   ;;  %s639_s8 = scalar_lea.hbm %s815_s5, 2048 }
  0x23   :  { %s49_s28 = sshll.u32 %s669_s26, 4  ;;  %p640_p2 = scmp.ne.s32.totalorder %s815_s5, %s639_s8  ;;  %s50_s28 = int_to_ptr.vmem [resolvable:$true] %s49_s28 }
  0x24   :  { %p643_p3 = scmp.lt.u32.totalorder %s639_s8, %s815_s5 }
  0x26   :  { %p645_p4 = pnand %p643_p3, %p640_p2 }
  0x28   :  { %648 = shalt.err (!%p645_p4)
}
  0x29   :  { %s649_s15 = scalar_lea.vmem %s50_s28, 2048  ;;  %p654_p6 = scmp.lt.s32.totalorder %s50_s28, %s50_s28 }
  0x2a   :  { %p650_p5 = scmp.ne.s32.totalorder %s50_s28, %s649_s15  ;;  %p655_p7 = scmp.lt.s32.totalorder %s649_s15, %s649_s15 }
  0x2c   :  { %p656_p8 = por %p655_p7, %p654_p6 }
  0x2e   :  { %p657_p9 = pnand %p656_p8, %p650_p5 }
  0x30   :  { %660 = shalt.err (!%p657_p9)
}
  0x31   :  { %55 = dma.hbm_to_vmem [thread:$0]  %s815_s5, 2048, %s50_s28, [#allocation5], %s667_s13, %s667_s13, %s668_s14  }
  0x32   :  { %661 = dma.done.wait [#allocation3], 2048  }
  0x33   :  { %662 = vsyncadd [#allocation3], 4294965248 }
  0x34   :  { %663 = dma.done.wait [#allocation5], 4096  }
  0x35   :  { %664 = vsyncadd [#allocation5], 4294963200  ;;  %v670_v0 = vmov 0.0|0.0   ;;  %vm671_vm0 = vmmov 0   ;;  %v672_v1 = vmov 0.0   ;;  %v68_v2 = vld [vmem:[#allocation2] sm:$0xff] }
  0x36   :  { %515 = vmatprep.subr.bf16.mxu0 %v670_v0  ;;  %442 = vmatprep.mubr.msk.f32.mxu0 %vm671_vm0, %v672_v1  ;;  %v69_v3 = vld [vmem:[#allocation2 + $0x8] sm:$0xff]  ;;  %v70_v4 = vld [vmem:[#allocation2 + $0x10] sm:$0xff]  ;;  %v71_v6 = vld [vmem:[#allocation2 + $0x18] sm:$0xff] }
  0x37   :  { %539 = vmatprep.subr.bf16.mxu1 %v670_v0  ;;  %477 = vmatprep.mubr.msk.f32.mxu1 %vm671_vm0, %v672_v1  ;;  %v516_v5 = vpack.c.bf16 %v69_v3, %v68_v2  ;;  %v519_v7 = vpack.c.bf16 %v71_v6, %v70_v4  ;;  %v72_v8 = vld [vmem:[#allocation2 + $0x20] sm:$0xff]  ;;  %v73_v9 = vld [vmem:[#allocation2 + $0x28] sm:$0xff]  ;;  %v164_v12 = vld [vmem:[#allocation4 + $0x10] sm:$0xff] }
  0x38   :  { %v162_v10 = vld [vmem:[#allocation4] sm:$0xff]  ;;  %v163_v11 = vld [vmem:[#allocation4 + $0x8] sm:$0xff]  ;;  %v165_v13 = vld [vmem:[#allocation4 + $0x18] sm:$0xff]  ;;  %v522_v14 = vpack.c.bf16 %v73_v9, %v72_v8 }
  0x39   :  { %517 = vmatpush3.bf16.msra.mxu0 %v516_v5  ;;  %v540_v15 = vpack.c.bf16 %v163_v11, %v162_v10  ;;  %v74_v16 = vld [vmem:[#allocation2 + $0x30] sm:$0xff]  ;;  %v75_v17 = vld [vmem:[#allocation2 + $0x38] sm:$0xff]  ;;  %v543_v18 = vpack.c.bf16 %v165_v13, %v164_v12  ;;  %v166_v19 = vld [vmem:[#allocation4 + $0x20] sm:$0xff] }
  0x3a   :  { %518 = vmatprep.subr.bf16.mxu0 %v670_v0  ;;  %v167_v20 = vld [vmem:[#allocation4 + $0x28] sm:$0xff]  ;;  %v525_v21 = vpack.c.bf16 %v75_v17, %v74_v16  ;;  %v76_v22 = vld [vmem:[#allocation2 + $0x40] sm:$0xff]  ;;  %v168_v25 = vld [vmem:[#allocation4 + $0x30] sm:$0xff] }
  0x3b   :  { %541 = vmatpush3.bf16.msra.mxu1 %v540_v15  ;;  %v77_v23 = vld [vmem:[#allocation2 + $0x48] sm:$0xff]  ;;  %v546_v24 = vpack.c.bf16 %v167_v20, %v166_v19  ;;  %v169_v26 = vld [vmem:[#allocation4 + $0x38] sm:$0xff]  ;;  %v78_v28 = vld [vmem:[#allocation2 + $0x50] sm:$0xff] }
  0x3c   :  { %542 = vmatprep.subr.bf16.mxu1 %v670_v0  ;;  %v528_v27 = vpack.c.bf16 %v77_v23, %v76_v22  ;;  %v79_v29 = vld [vmem:[#allocation2 + $0x58] sm:$0xff]  ;;  %v549_v30 = vpack.c.bf16 %v169_v26, %v168_v25  ;;  %v170_v31 = vld [vmem:[#allocation4 + $0x40] sm:$0xff]  ;;  %v171_v32 = vld [vmem:[#allocation4 + $0x48] sm:$0xff] }
  0x3d   :  { %520 = vmatpush3.bf16.msra.mxu0 %v519_v7  ;;  %v531_v33 = vpack.c.bf16 %v79_v29, %v78_v28  ;;  %v80_v34 = vld [vmem:[#allocation2 + $0x60] sm:$0xff]  ;;  %v81_v35 = vld [vmem:[#allocation2 + $0x68] sm:$0xff]  ;;  %v552_v36 = vpack.c.bf16 %v171_v32, %v170_v31  ;;  %v172_v37 = vld [vmem:[#allocation4 + $0x50] sm:$0xff] }
  0x3e   :  { %521 = vmatprep.subr.bf16.mxu0 %v670_v0  ;;  %v173_v38 = vld [vmem:[#allocation4 + $0x58] sm:$0xff]  ;;  %v534_v39 = vpack.c.bf16 %v81_v35, %v80_v34  ;;  %v82_v40 = vld [vmem:[#allocation2 + $0x70] sm:$0xff]  ;;  %v174_v43 = vld [vmem:[#allocation4 + $0x60] sm:$0xff] }
  0x3f   :  { %544 = vmatpush3.bf16.msra.mxu1 %v543_v18  ;;  %v83_v41 = vld [vmem:[#allocation2 + $0x78] sm:$0xff]  ;;  %v555_v42 = vpack.c.bf16 %v173_v38, %v172_v37  ;;  %v175_v44 = vld [vmem:[#allocation4 + $0x68] sm:$0xff]  ;;  %v67_v47 = vld [vmem:[%s810_s0] sm:$0xff] }
  0x40   :  { %545 = vmatprep.subr.bf16.mxu1 %v670_v0  ;;  %v537_v45 = vpack.c.bf16 %v83_v41, %v82_v40  ;;  %v558_v46 = vpack.c.bf16 %v175_v44, %v174_v43  ;;  %v176_v48 = vld [vmem:[#allocation4 + $0x70] sm:$0xff]  ;;  %v177_v49 = vld [vmem:[#allocation4 + $0x78] sm:$0xff]  ;;  %v256_v51 = vld [vmem:[#allocation6] sm:$0xff] }
  0x41   :  { %523 = vmatpush3.bf16.msra.mxu0 %v522_v14  ;;  %v561_v50 = vpack.c.bf16 %v177_v49, %v176_v48  ;;  %v257_v52 = vld [vmem:[#allocation6 + $0x8] sm:$0xff]  ;;  %v258_v53 = vld [vmem:[#allocation6 + $0x10] sm:$0xff]  ;;  %v259_v55 = vld [vmem:[#allocation6 + $0x18] sm:$0xff] }
  0x42   :  { %524 = vmatprep.subr.bf16.mxu0 %v670_v0  ;;  %v564_v54 = vpack.c.bf16 %v257_v52, %v256_v51  ;;  %v567_v56 = vpack.c.bf16 %v259_v55, %v258_v53  ;;  %v260_v57 = vld [vmem:[#allocation6 + $0x20] sm:$0xff]  ;;  %v261_v58 = vld [vmem:[#allocation6 + $0x28] sm:$0xff]  ;;  %v262_v60 = vld [vmem:[#allocation6 + $0x30] sm:$0xff] }
  0x43   :  { %547 = vmatpush3.bf16.msra.mxu1 %v546_v24  ;;  %v570_v59 = vpack.c.bf16 %v261_v58, %v260_v57  ;;  %v263_v61 = vld [vmem:[#allocation6 + $0x38] sm:$0xff]  ;;  %v264_v63 = vld [vmem:[#allocation6 + $0x40] sm:$0xff]  ;;  %v266_v3 = vld [vmem:[#allocation6 + $0x50] sm:$0xff] }
  0x44   :  { %548 = vmatprep.subr.bf16.mxu1 %v670_v0  ;;  %v573_v62 = vpack.c.bf16 %v263_v61, %v262_v60  ;;  %v267_v4 = vld [vmem:[#allocation6 + $0x58] sm:$0xff]  ;;  %v268_v6 = vld [vmem:[#allocation6 + $0x60] sm:$0xff]  ;;  %v269_v7 = vld [vmem:[#allocation6 + $0x68] sm:$0xff] }
  0x45   :  { %526 = vmatpush3.bf16.msra.mxu0 %v525_v21  ;;  %v579_v5 = vpack.c.bf16 %v267_v4, %v266_v3  ;;  %v582_v8 = vpack.c.bf16 %v269_v7, %v268_v6  ;;  %v356_v9 = vld [vmem:[%s812_s2] ss:$0 sm:$0xff]  ;;  %v270_v14 = vld [vmem:[#allocation6 + $0x70] sm:$0xff]  ;;  %v271_v15 = vld [vmem:[#allocation6 + $0x78] sm:$0xff] }
  0x46   :  { %527 = vmatprep.subr.bf16.mxu0 %v670_v0  ;;  %v585_v16 = vpack.c.bf16 %v271_v15, %v270_v14  ;;  %v357_v17 = vld [vmem:[%s814_s4] ss:$0 sm:$0xff] }
  0x47   :  { %550 = vmatpush3.bf16.msra.mxu1 %v549_v30  ;;  %v358_v21 = vld [vmem:[%s816_s6] ss:$0 sm:$0xff] }
  0x48   :  { %551 = vmatprep.subr.bf16.mxu1 %v670_v0 }
  0x49   :  { %529 = vmatpush3.bf16.msra.mxu0 %v528_v27 }
  0x4a   :  { %530 = vmatprep.subr.bf16.mxu0 %v670_v0 }
  0x4b   :  { %553 = vmatpush3.bf16.msra.mxu1 %v552_v36 }
  0x4c   :  { %554 = vmatprep.subr.bf16.mxu1 %v670_v0 }
  0x4d   :  { %532 = vmatpush3.bf16.msra.mxu0 %v531_v33 }
  0x4e   :  { %533 = vmatprep.subr.bf16.mxu0 %v670_v0 }
  0x4f   :  { %556 = vmatpush3.bf16.msra.mxu1 %v555_v42 }
  0x50   :  { %557 = vmatprep.subr.bf16.mxu1 %v670_v0 }
  0x51   :  { %535 = vmatpush3.bf16.msra.mxu0 %v534_v39 }
  0x52   :  { %536 = vmatprep.subr.bf16.mxu0 %v670_v0 }
  0x53   :  { %559 = vmatpush3.bf16.msra.mxu1 %v558_v46 }
  0x54   :  { %560 = vmatprep.subr.bf16.mxu1 %v670_v0 }
  0x55   :  { %538 = vmatpush3.bf16.msra.mxu0 %v537_v45 }
  0x56   :  { %563 = vmatprep.subr.bf16.mxu0 %v670_v0 }
  0x57   :  { %562 = vmatpush3.bf16.msra.mxu1 %v561_v50 }
  0x58   :  { %443 = vmatmul.mubr.f32.vlgmr.msra.gmra.mrb[0].mxu0 %v67_v47 }
  0x59   :  { %512 = vmatprep.mubr.msk.f32.mxu0 %vm671_vm0, %v672_v1  ;;  %565 = vmatpush3.bf16.msra.mxu0 %v564_v54  ;;  %v265_v1 = vld [vmem:[#allocation6 + $0x48] sm:$0xff] }
  0x5a   :  { %566 = vmatprep.subr.bf16.mxu0 %v670_v0  ;;  %v576_v2 = vpack.c.bf16 %v265_v1, %v264_v63 }
  0x5d   :  { %568 = vmatpush3.bf16.msra.mxu0 %v567_v56 }
  0x5e   :  { %569 = vmatprep.subr.bf16.mxu0 %v670_v0 }
  0x61   :  { %571 = vmatpush3.bf16.msra.mxu0 %v570_v59 }
  0x62   :  { %572 = vmatprep.subr.bf16.mxu0 %v670_v0 }
  0x65   :  { %574 = vmatpush3.bf16.msra.mxu0 %v573_v62 }
  0x66   :  { %575 = vmatprep.subr.bf16.mxu0 %v670_v0 }
  0x69   :  { %577 = vmatpush3.bf16.msra.mxu0 %v576_v2 }
  0x6a   :  { %578 = vmatprep.subr.bf16.mxu0 %v670_v0 }
  0x6d   :  { %580 = vmatpush3.bf16.msra.mxu0 %v579_v5 }
  0x6e   :  { %581 = vmatprep.subr.bf16.mxu0 %v670_v0 }
  0x71   :  { %583 = vmatpush3.bf16.msra.mxu0 %v582_v8 }
  0x72   :  { %584 = vmatprep.subr.bf16.mxu0 %v670_v0 }
  0x75   :  { %586 = vmatpush3.bf16.msra.mxu0 %v585_v16 }
 0x12b   :  { %v157_v10 = vpop.f32.mrb[0].mxu0 }
 0x12c   :  { %v158_v11 = vadd.f32 %v356_v9, %v157_v10  ;;  %v444_v12 = vpop.f32.mrb[1].mxu0 }
 0x12e   :  { %v161_v13 = vmax.f32 %v158_v11, 0.0 }
 0x130   :  { %478 = vmatmul.mubr.f32.vlgmr.msra.gmra.mrb[0].mxu1 %v161_v13 }
 0x203   :  { %v251_v18 = vpop.f32.mrb[0].mxu1 }
 0x204   :  { %v252_v19 = vadd.f32 %v357_v17, %v251_v18  ;;  %v479_v0 = vpop.f32.mrb[1].mxu1 }
 0x206   :  { %v255_v20 = vmax.f32 %v252_v19, 0.0 }
 0x208   :  { %513 = vmatmul.mubr.f32.vlgmr.msra.gmra.mrb[2].mxu0 %v255_v20 }
 0x2db   :  { %v345_v22 = vpop.f32.mrb[2].mxu0 }
 0x2dc   :  { %v346_v23 = vadd.f32 %v358_v21, %v345_v22  ;;  %v514_v24 = vpop.f32.mrb[3].mxu0 }
 0x2de   :  { %349 = vst [vmem:[%s817_s7] sm:$0xff] %v346_v23 }
 0x2df   :  { %354 = vsyncpa [#allocation3], 1 }
 0x2e0   :  { %355 = vsyncpa [#allocation5], 1 }

</bundles_post_ra>
